<compile_context>
chip_gen: v7x
topology: tpu7x:2x2x1
jax: 0.10.0
libtpu: 0.0.40
codegen_flags: <defaults>
</compile_context>

<pallas_src>
import jax
import jax.numpy as jnp
from jax.experimental import pallas as pl
from jax.experimental.pallas import tpu as pltpu

# ---- config (small, consistent with the BertConfig fields used) ----
B = 2               # batch
S = 8               # sequence length
H = 128             # hidden_size (multiple of 128 -> lane-dense stores)
VOCAB = 512         # vocab_size (small for the test)
MAX_POS = 64        # max_position_embeddings
TYPE_VOCAB = 2      # type_vocab_size
PAD_TOKEN_ID = 0    # padding_idx (forward pass is a plain lookup, unaffected)
LN_EPS = 1e-12      # layer_norm_eps
N = B * S           # flattened token count
TILE_N = S          # token tile = one sequence row -> positions are rows 0..S-1

assert N % TILE_N == 0 and TILE_N % 8 == 0 and TILE_N == S


def bert_embeddings_kernel(ids_ref,      # (N,) int32, SMEM (scalar prefetch)
                           tts_ref,      # (TILE_N, 1) int32, VMEM
                           word_hbm,     # (VOCAB, H) f32, HBM (pl.ANY)
                           pos_ref,      # (TILE_N, H) f32, VMEM (table rows 0..S-1)
                           tt_ref,       # (TYPE_VOCAB, H) f32, VMEM
                           gamma_ref,    # (1, H) f32
                           beta_ref,     # (1, H) f32
                           out_ref,      # (TILE_N, H) f32
                           gather_buf,   # (TILE_N, H) f32 scratch
                           dma_sems):    # (TILE_N,) DMA semaphores
    i = pl.program_id(0)

    # ---- word-embedding gather: one row DMA per token, all in flight, one wait
    copies = []
    for r in range(TILE_N):
        tok = ids_ref[i * TILE_N + r]
        cp = pltpu.make_async_copy(word_hbm.at[tok], gather_buf.at[r], dma_sems.at[r])
        cp.start()
        copies.append(cp)
    for cp in copies:
        cp.wait()

    # ---- token-type lookup: pure-VPU select chain over the tiny type vocab
    tts = tts_ref[...]                                          # (TILE_N, 1)
    tt_emb = jnp.broadcast_to(tt_ref[0:1, :], (TILE_N, H))
    for t in range(1, TYPE_VOCAB):
        tt_emb = jnp.where(tts == t, tt_ref[t:t + 1, :], tt_emb)

    # ---- sum of embeddings; position tile is the resident arange(S) table slice
    x = gather_buf[...] + tt_emb + pos_ref[...]

    # ---- LayerNorm over hidden axis (biased variance); gamma/beta are (1, H)
    mean = jnp.mean(x, axis=-1, keepdims=True)
    var = jnp.mean((x - mean) ** 2, axis=-1, keepdims=True)
    y = (x - mean) * jax.lax.rsqrt(var + LN_EPS) * gamma_ref[...] + beta_ref[...]

    # dropout(hidden_dropout_prob) is the identity in eval mode
    out_ref[...] = y.astype(out_ref.dtype)


def bert_embeddings_forward(input_ids, token_type_ids,
                            word_tab, pos_tab, tt_tab, gamma, beta):
    ids_flat = input_ids.reshape(N).astype(jnp.int32)          # scalar-prefetched
    tts_col = token_type_ids.reshape(N, 1).astype(jnp.int32)   # per-token column

    grid_spec = pltpu.PrefetchScalarGridSpec(
        num_scalar_prefetch=1,
        grid=(N // TILE_N,),
        in_specs=[
            pl.BlockSpec((TILE_N, 1), lambda i, ids: (i, 0)),        # token-type ids
            pl.BlockSpec(memory_space=pl.ANY),                       # word table in HBM
            pl.BlockSpec((TILE_N, H), lambda i, ids: (0, 0)),        # pos rows 0..S-1 (resident)
            pl.BlockSpec((TYPE_VOCAB, H), lambda i, ids: (0, 0)),    # full token-type table
            pl.BlockSpec((1, H), lambda i, ids: (0, 0)),             # gamma
            pl.BlockSpec((1, H), lambda i, ids: (0, 0)),             # beta
        ],
        out_specs=pl.BlockSpec((TILE_N, H), lambda i, ids: (i, 0)),
        scratch_shapes=[
            pltpu.VMEM((TILE_N, H), jnp.float32),
            pltpu.SemaphoreType.DMA((TILE_N,)),
        ],
    )

    out = pl.pallas_call(
        bert_embeddings_kernel,
        out_shape=jax.ShapeDtypeStruct((N, H), jnp.float32),
        grid_spec=grid_spec,
        compiler_params=pltpu.CompilerParams(
            dimension_semantics=("parallel",)),
    )(ids_flat, tts_col,
      word_tab, pos_tab, tt_tab,
      gamma.reshape(1, H), beta.reshape(1, H))
    return out.reshape(B, S, H)


# ---------------- pure-JAX reference (for sanity check) ----------------
def bert_embeddings_ref(input_ids, token_type_ids,
                        word_tab, pos_tab, tt_tab, gamma, beta):
    pos_ids = jnp.arange(S)
    x = word_tab[input_ids] + tt_tab[token_type_ids] + pos_tab[pos_ids][None, :, :]
    mean = jnp.mean(x, axis=-1, keepdims=True)
    var = jnp.mean((x - mean) ** 2, axis=-1, keepdims=True)
    return (x - mean) / jnp.sqrt(var + LN_EPS) * gamma + beta


if __name__ == "__main__":
    key = jax.random.PRNGKey(0)
    k_ids, k_tt, k_w, k_p, k_t, k_g, k_b = jax.random.split(key, 7)

    input_ids = jax.random.randint(k_ids, (B, S), 0, VOCAB, dtype=jnp.int32)
    token_type_ids = jax.random.randint(k_tt, (B, S), 0, TYPE_VOCAB, dtype=jnp.int32)

    word_tab = jax.random.normal(k_w, (VOCAB, H), jnp.float32) * 0.02
    word_tab = word_tab.at[PAD_TOKEN_ID].set(0.0)   # padding_idx row zero-initialized
    pos_tab = jax.random.normal(k_p, (MAX_POS, H), jnp.float32) * 0.02
    tt_tab = jax.random.normal(k_t, (TYPE_VOCAB, H), jnp.float32) * 0.02
    gamma = 1.0 + 0.1 * jax.random.normal(k_g, (H,), jnp.float32)
    beta = 0.1 * jax.random.normal(k_b, (H,), jnp.float32)

    out = bert_embeddings_forward(input_ids, token_type_ids,
                                  word_tab, pos_tab, tt_tab, gamma, beta)
    out = jax.block_until_ready(out)

    ref = bert_embeddings_ref(input_ids, token_type_ids,
                              word_tab, pos_tab, tt_tab, gamma, beta)
    assert out.shape == (B, S, H)
    assert jnp.allclose(out, ref, rtol=1e-5, atol=1e-5), "mismatch vs pure-JAX reference"

    print("KERNEL_OK")
</pallas_src>

<mosaic_0001>
module attributes {stable_mosaic.version = 11 : i64} {
  func.func @bert_embeddings_kernel(%arg0: i32, %arg1: memref<16xi32, #tpu.memory_space<smem>>, %arg2: memref<8x1xi32, #tpu.memory_space<vmem>>, %arg3: memref<512x128xf32, #tpu.memory_space<any>>, %arg4: memref<8x128xf32, #tpu.memory_space<vmem>>, %arg5: memref<2x128xf32, #tpu.memory_space<vmem>>, %arg6: memref<1x128xf32, #tpu.memory_space<vmem>>, %arg7: memref<1x128xf32, #tpu.memory_space<vmem>>, %arg8: memref<8x128xf32, #tpu.memory_space<vmem>>, %arg9: memref<8x128xf32, #tpu.memory_space<vmem>>, %arg10: memref<8x!tpu.dma_semaphore, #tpu.memory_space<semaphore_mem>>) attributes {dimension_semantics = [#tpu.dimension_semantics<parallel>], iteration_bounds = array<i64: 2>, scalar_prefetch = 1 : i64, scratch_operands = 2 : i64, tpu.core_type = #tpu.core_type<tc>, window_params = [{transform_indices = @transform_0, window_bounds = array<i64: 8, 1>}, {}, {transform_indices = @transform_2, window_bounds = array<i64: 8, 128>}, {pipeline_mode = #tpu.pipeline_mode<synchronous>, transform_indices = @transform_3, window_bounds = array<i64: 2, 128>}, {pipeline_mode = #tpu.pipeline_mode<synchronous>, transform_indices = @transform_4, window_bounds = array<i64: 1, 128>}, {pipeline_mode = #tpu.pipeline_mode<synchronous>, transform_indices = @transform_5, window_bounds = array<i64: 1, 128>}, {transform_indices = @transform_6, window_bounds = array<i64: 8, 128>}]} {
    %c8_i32 = arith.constant 8 : i32
    %0 = arith.muli %arg0, %c8_i32 : i32
    %c0_i32 = arith.constant 0 : i32
    %1 = arith.addi %0, %c0_i32 : i32
    %2 = arith.index_cast %1 : i32 to index
    %3 = memref.load %arg1[%2] : memref<16xi32, #tpu.memory_space<smem>>
    %c0_i32_0 = arith.constant 0 : i32
    %c0_i32_1 = arith.constant 0 : i32
    %c0_i32_2 = arith.constant 0 : i32
    %4 = tpu.memref_slice %arg3[%3, %c0_i32_2] : memref<512x128xf32, #tpu.memory_space<any>> -> memref<1x128xf32, #tpu.memory_space<any>>
    %5 = tpu.memref_squeeze %4 : memref<1x128xf32, #tpu.memory_space<any>> -> memref<128xf32, #tpu.memory_space<any>>
    %c0_i32_3 = arith.constant 0 : i32
    %6 = tpu.memref_slice %arg9[%c0_i32_0, %c0_i32_3] : memref<8x128xf32, #tpu.memory_space<vmem>> -> memref<1x128xf32, #tpu.memory_space<vmem>>
    %7 = tpu.memref_squeeze %6 : memref<1x128xf32, #tpu.memory_space<vmem>> -> memref<128xf32, #tpu.memory_space<vmem>>
    %8 = tpu.memref_slice %arg10[%c0_i32_1] : memref<8x!tpu.dma_semaphore, #tpu.memory_space<semaphore_mem>> -> memref<1x!tpu.dma_semaphore, #tpu.memory_space<semaphore_mem>>
    %9 = tpu.memref_squeeze %8 : memref<1x!tpu.dma_semaphore, #tpu.memory_space<semaphore_mem>> -> memref<!tpu.dma_semaphore, #tpu.memory_space<semaphore_mem>>
    tpu.enqueue_dma source(%5 : memref<128xf32, #tpu.memory_space<any>>) target(%7 : memref<128xf32, #tpu.memory_space<vmem>>) target_semaphore(%9 : memref<!tpu.dma_semaphore, #tpu.memory_space<semaphore_mem>>)
    %c8_i32_4 = arith.constant 8 : i32
    %10 = arith.muli %arg0, %c8_i32_4 : i32
    %c1_i32 = arith.constant 1 : i32
    %11 = arith.addi %10, %c1_i32 : i32
    %12 = arith.index_cast %11 : i32 to index
    %13 = memref.load %arg1[%12] : memref<16xi32, #tpu.memory_space<smem>>
    %c1_i32_5 = arith.constant 1 : i32
    %c1_i32_6 = arith.constant 1 : i32
    %c0_i32_7 = arith.constant 0 : i32
    %14 = tpu.memref_slice %arg3[%13, %c0_i32_7] : memref<512x128xf32, #tpu.memory_space<any>> -> memref<1x128xf32, #tpu.memory_space<any>>
    %15 = tpu.memref_squeeze %14 : memref<1x128xf32, #tpu.memory_space<any>> -> memref<128xf32, #tpu.memory_space<any>>
    %c0_i32_8 = arith.constant 0 : i32
    %16 = tpu.memref_slice %arg9[%c1_i32_5, %c0_i32_8] : memref<8x128xf32, #tpu.memory_space<vmem>> -> memref<1x128xf32, #tpu.memory_space<vmem>>
    %17 = tpu.memref_squeeze %16 : memref<1x128xf32, #tpu.memory_space<vmem>> -> memref<128xf32, #tpu.memory_space<vmem>>
    %18 = tpu.memref_slice %arg10[%c1_i32_6] : memref<8x!tpu.dma_semaphore, #tpu.memory_space<semaphore_mem>> -> memref<1x!tpu.dma_semaphore, #tpu.memory_space<semaphore_mem>>
    %19 = tpu.memref_squeeze %18 : memref<1x!tpu.dma_semaphore, #tpu.memory_space<semaphore_mem>> -> memref<!tpu.dma_semaphore, #tpu.memory_space<semaphore_mem>>
    tpu.enqueue_dma source(%15 : memref<128xf32, #tpu.memory_space<any>>) target(%17 : memref<128xf32, #tpu.memory_space<vmem>>) target_semaphore(%19 : memref<!tpu.dma_semaphore, #tpu.memory_space<semaphore_mem>>)
    %c8_i32_9 = arith.constant 8 : i32
    %20 = arith.muli %arg0, %c8_i32_9 : i32
    %c2_i32 = arith.constant 2 : i32
    %21 = arith.addi %20, %c2_i32 : i32
    %22 = arith.index_cast %21 : i32 to index
    %23 = memref.load %arg1[%22] : memref<16xi32, #tpu.memory_space<smem>>
    %c2_i32_10 = arith.constant 2 : i32
    %c2_i32_11 = arith.constant 2 : i32
    %c0_i32_12 = arith.constant 0 : i32
    %24 = tpu.memref_slice %arg3[%23, %c0_i32_12] : memref<512x128xf32, #tpu.memory_space<any>> -> memref<1x128xf32, #tpu.memory_space<any>>
    %25 = tpu.memref_squeeze %24 : memref<1x128xf32, #tpu.memory_space<any>> -> memref<128xf32, #tpu.memory_space<any>>
    %c0_i32_13 = arith.constant 0 : i32
    %26 = tpu.memref_slice %arg9[%c2_i32_10, %c0_i32_13] : memref<8x128xf32, #tpu.memory_space<vmem>> -> memref<1x128xf32, #tpu.memory_space<vmem>>
    %27 = tpu.memref_squeeze %26 : memref<1x128xf32, #tpu.memory_space<vmem>> -> memref<128xf32, #tpu.memory_space<vmem>>
    %28 = tpu.memref_slice %arg10[%c2_i32_11] : memref<8x!tpu.dma_semaphore, #tpu.memory_space<semaphore_mem>> -> memref<1x!tpu.dma_semaphore, #tpu.memory_space<semaphore_mem>>
    %29 = tpu.memref_squeeze %28 : memref<1x!tpu.dma_semaphore, #tpu.memory_space<semaphore_mem>> -> memref<!tpu.dma_semaphore, #tpu.memory_space<semaphore_mem>>
    tpu.enqueue_dma source(%25 : memref<128xf32, #tpu.memory_space<any>>) target(%27 : memref<128xf32, #tpu.memory_space<vmem>>) target_semaphore(%29 : memref<!tpu.dma_semaphore, #tpu.memory_space<semaphore_mem>>)
    %c8_i32_14 = arith.constant 8 : i32
    %30 = arith.muli %arg0, %c8_i32_14 : i32
    %c3_i32 = arith.constant 3 : i32
    %31 = arith.addi %30, %c3_i32 : i32
    %32 = arith.index_cast %31 : i32 to index
    %33 = memref.load %arg1[%32] : memref<16xi32, #tpu.memory_space<smem>>
    %c3_i32_15 = arith.constant 3 : i32
    %c3_i32_16 = arith.constant 3 : i32
    %c0_i32_17 = arith.constant 0 : i32
    %34 = tpu.memref_slice %arg3[%33, %c0_i32_17] : memref<512x128xf32, #tpu.memory_space<any>> -> memref<1x128xf32, #tpu.memory_space<any>>
    %35 = tpu.memref_squeeze %34 : memref<1x128xf32, #tpu.memory_space<any>> -> memref<128xf32, #tpu.memory_space<any>>
    %c0_i32_18 = arith.constant 0 : i32
    %36 = tpu.memref_slice %arg9[%c3_i32_15, %c0_i32_18] : memref<8x128xf32, #tpu.memory_space<vmem>> -> memref<1x128xf32, #tpu.memory_space<vmem>>
    %37 = tpu.memref_squeeze %36 : memref<1x128xf32, #tpu.memory_space<vmem>> -> memref<128xf32, #tpu.memory_space<vmem>>
    %38 = tpu.memref_slice %arg10[%c3_i32_16] : memref<8x!tpu.dma_semaphore, #tpu.memory_space<semaphore_mem>> -> memref<1x!tpu.dma_semaphore, #tpu.memory_space<semaphore_mem>>
    %39 = tpu.memref_squeeze %38 : memref<1x!tpu.dma_semaphore, #tpu.memory_space<semaphore_mem>> -> memref<!tpu.dma_semaphore, #tpu.memory_space<semaphore_mem>>
    tpu.enqueue_dma source(%35 : memref<128xf32, #tpu.memory_space<any>>) target(%37 : memref<128xf32, #tpu.memory_space<vmem>>) target_semaphore(%39 : memref<!tpu.dma_semaphore, #tpu.memory_space<semaphore_mem>>)
    %c8_i32_19 = arith.constant 8 : i32
    %40 = arith.muli %arg0, %c8_i32_19 : i32
    %c4_i32 = arith.constant 4 : i32
    %41 = arith.addi %40, %c4_i32 : i32
    %42 = arith.index_cast %41 : i32 to index
    %43 = memref.load %arg1[%42] : memref<16xi32, #tpu.memory_space<smem>>
    %c4_i32_20 = arith.constant 4 : i32
    %c4_i32_21 = arith.constant 4 : i32
    %c0_i32_22 = arith.constant 0 : i32
    %44 = tpu.memref_slice %arg3[%43, %c0_i32_22] : memref<512x128xf32, #tpu.memory_space<any>> -> memref<1x128xf32, #tpu.memory_space<any>>
    %45 = tpu.memref_squeeze %44 : memref<1x128xf32, #tpu.memory_space<any>> -> memref<128xf32, #tpu.memory_space<any>>
    %c0_i32_23 = arith.constant 0 : i32
    %46 = tpu.memref_slice %arg9[%c4_i32_20, %c0_i32_23] : memref<8x128xf32, #tpu.memory_space<vmem>> -> memref<1x128xf32, #tpu.memory_space<vmem>>
    %47 = tpu.memref_squeeze %46 : memref<1x128xf32, #tpu.memory_space<vmem>> -> memref<128xf32, #tpu.memory_space<vmem>>
    %48 = tpu.memref_slice %arg10[%c4_i32_21] : memref<8x!tpu.dma_semaphore, #tpu.memory_space<semaphore_mem>> -> memref<1x!tpu.dma_semaphore, #tpu.memory_space<semaphore_mem>>
    %49 = tpu.memref_squeeze %48 : memref<1x!tpu.dma_semaphore, #tpu.memory_space<semaphore_mem>> -> memref<!tpu.dma_semaphore, #tpu.memory_space<semaphore_mem>>
    tpu.enqueue_dma source(%45 : memref<128xf32, #tpu.memory_space<any>>) target(%47 : memref<128xf32, #tpu.memory_space<vmem>>) target_semaphore(%49 : memref<!tpu.dma_semaphore, #tpu.memory_space<semaphore_mem>>)
    %c8_i32_24 = arith.constant 8 : i32
    %50 = arith.muli %arg0, %c8_i32_24 : i32
    %c5_i32 = arith.constant 5 : i32
    %51 = arith.addi %50, %c5_i32 : i32
    %52 = arith.index_cast %51 : i32 to index
    %53 = memref.load %arg1[%52] : memref<16xi32, #tpu.memory_space<smem>>
    %c5_i32_25 = arith.constant 5 : i32
    %c5_i32_26 = arith.constant 5 : i32
    %c0_i32_27 = arith.constant 0 : i32
    %54 = tpu.memref_slice %arg3[%53, %c0_i32_27] : memref<512x128xf32, #tpu.memory_space<any>> -> memref<1x128xf32, #tpu.memory_space<any>>
    %55 = tpu.memref_squeeze %54 : memref<1x128xf32, #tpu.memory_space<any>> -> memref<128xf32, #tpu.memory_space<any>>
    %c0_i32_28 = arith.constant 0 : i32
    %56 = tpu.memref_slice %arg9[%c5_i32_25, %c0_i32_28] : memref<8x128xf32, #tpu.memory_space<vmem>> -> memref<1x128xf32, #tpu.memory_space<vmem>>
    %57 = tpu.memref_squeeze %56 : memref<1x128xf32, #tpu.memory_space<vmem>> -> memref<128xf32, #tpu.memory_space<vmem>>
    %58 = tpu.memref_slice %arg10[%c5_i32_26] : memref<8x!tpu.dma_semaphore, #tpu.memory_space<semaphore_mem>> -> memref<1x!tpu.dma_semaphore, #tpu.memory_space<semaphore_mem>>
    %59 = tpu.memref_squeeze %58 : memref<1x!tpu.dma_semaphore, #tpu.memory_space<semaphore_mem>> -> memref<!tpu.dma_semaphore, #tpu.memory_space<semaphore_mem>>
    tpu.enqueue_dma source(%55 : memref<128xf32, #tpu.memory_space<any>>) target(%57 : memref<128xf32, #tpu.memory_space<vmem>>) target_semaphore(%59 : memref<!tpu.dma_semaphore, #tpu.memory_space<semaphore_mem>>)
    %c8_i32_29 = arith.constant 8 : i32
    %60 = arith.muli %arg0, %c8_i32_29 : i32
    %c6_i32 = arith.constant 6 : i32
    %61 = arith.addi %60, %c6_i32 : i32
    %62 = arith.index_cast %61 : i32 to index
    %63 = memref.load %arg1[%62] : memref<16xi32, #tpu.memory_space<smem>>
    %c6_i32_30 = arith.constant 6 : i32
    %c6_i32_31 = arith.constant 6 : i32
    %c0_i32_32 = arith.constant 0 : i32
    %64 = tpu.memref_slice %arg3[%63, %c0_i32_32] : memref<512x128xf32, #tpu.memory_space<any>> -> memref<1x128xf32, #tpu.memory_space<any>>
    %65 = tpu.memref_squeeze %64 : memref<1x128xf32, #tpu.memory_space<any>> -> memref<128xf32, #tpu.memory_space<any>>
    %c0_i32_33 = arith.constant 0 : i32
    %66 = tpu.memref_slice %arg9[%c6_i32_30, %c0_i32_33] : memref<8x128xf32, #tpu.memory_space<vmem>> -> memref<1x128xf32, #tpu.memory_space<vmem>>
    %67 = tpu.memref_squeeze %66 : memref<1x128xf32, #tpu.memory_space<vmem>> -> memref<128xf32, #tpu.memory_space<vmem>>
    %68 = tpu.memref_slice %arg10[%c6_i32_31] : memref<8x!tpu.dma_semaphore, #tpu.memory_space<semaphore_mem>> -> memref<1x!tpu.dma_semaphore, #tpu.memory_space<semaphore_mem>>
    %69 = tpu.memref_squeeze %68 : memref<1x!tpu.dma_semaphore, #tpu.memory_space<semaphore_mem>> -> memref<!tpu.dma_semaphore, #tpu.memory_space<semaphore_mem>>
    tpu.enqueue_dma source(%65 : memref<128xf32, #tpu.memory_space<any>>) target(%67 : memref<128xf32, #tpu.memory_space<vmem>>) target_semaphore(%69 : memref<!tpu.dma_semaphore, #tpu.memory_space<semaphore_mem>>)
    %c8_i32_34 = arith.constant 8 : i32
    %70 = arith.muli %arg0, %c8_i32_34 : i32
    %c7_i32 = arith.constant 7 : i32
    %71 = arith.addi %70, %c7_i32 : i32
    %72 = arith.index_cast %71 : i32 to index
    %73 = memref.load %arg1[%72] : memref<16xi32, #tpu.memory_space<smem>>
    %c7_i32_35 = arith.constant 7 : i32
    %c7_i32_36 = arith.constant 7 : i32
    %c0_i32_37 = arith.constant 0 : i32
    %74 = tpu.memref_slice %arg3[%73, %c0_i32_37] : memref<512x128xf32, #tpu.memory_space<any>> -> memref<1x128xf32, #tpu.memory_space<any>>
    %75 = tpu.memref_squeeze %74 : memref<1x128xf32, #tpu.memory_space<any>> -> memref<128xf32, #tpu.memory_space<any>>
    %c0_i32_38 = arith.constant 0 : i32
    %76 = tpu.memref_slice %arg9[%c7_i32_35, %c0_i32_38] : memref<8x128xf32, #tpu.memory_space<vmem>> -> memref<1x128xf32, #tpu.memory_space<vmem>>
    %77 = tpu.memref_squeeze %76 : memref<1x128xf32, #tpu.memory_space<vmem>> -> memref<128xf32, #tpu.memory_space<vmem>>
    %78 = tpu.memref_slice %arg10[%c7_i32_36] : memref<8x!tpu.dma_semaphore, #tpu.memory_space<semaphore_mem>> -> memref<1x!tpu.dma_semaphore, #tpu.memory_space<semaphore_mem>>
    %79 = tpu.memref_squeeze %78 : memref<1x!tpu.dma_semaphore, #tpu.memory_space<semaphore_mem>> -> memref<!tpu.dma_semaphore, #tpu.memory_space<semaphore_mem>>
    tpu.enqueue_dma source(%75 : memref<128xf32, #tpu.memory_space<any>>) target(%77 : memref<128xf32, #tpu.memory_space<vmem>>) target_semaphore(%79 : memref<!tpu.dma_semaphore, #tpu.memory_space<semaphore_mem>>)
    %c0_i32_39 = arith.constant 0 : i32
    %c0_i32_40 = arith.constant 0 : i32
    %c0_i32_41 = arith.constant 0 : i32
    %80 = tpu.memref_slice %arg3[%3, %c0_i32_41] : memref<512x128xf32, #tpu.memory_space<any>> -> memref<1x128xf32, #tpu.memory_space<any>>
    %81 = tpu.memref_squeeze %80 : memref<1x128xf32, #tpu.memory_space<any>> -> memref<128xf32, #tpu.memory_space<any>>
    %c0_i32_42 = arith.constant 0 : i32
    %82 = tpu.memref_slice %arg9[%c0_i32_39, %c0_i32_42] : memref<8x128xf32, #tpu.memory_space<vmem>> -> memref<1x128xf32, #tpu.memory_space<vmem>>
    %83 = tpu.memref_squeeze %82 : memref<1x128xf32, #tpu.memory_space<vmem>> -> memref<128xf32, #tpu.memory_space<vmem>>
    %84 = tpu.memref_slice %arg10[%c0_i32_40] : memref<8x!tpu.dma_semaphore, #tpu.memory_space<semaphore_mem>> -> memref<1x!tpu.dma_semaphore, #tpu.memory_space<semaphore_mem>>
    %85 = tpu.memref_squeeze %84 : memref<1x!tpu.dma_semaphore, #tpu.memory_space<semaphore_mem>> -> memref<!tpu.dma_semaphore, #tpu.memory_space<semaphore_mem>>
    tpu.wait_dma2 semaphore(%85 : memref<!tpu.dma_semaphore, #tpu.memory_space<semaphore_mem>>) src(%81 : memref<128xf32, #tpu.memory_space<any>>) dst(%83 : memref<128xf32, #tpu.memory_space<vmem>>)
    %c1_i32_43 = arith.constant 1 : i32
    %c1_i32_44 = arith.constant 1 : i32
    %c0_i32_45 = arith.constant 0 : i32
    %86 = tpu.memref_slice %arg3[%13, %c0_i32_45] : memref<512x128xf32, #tpu.memory_space<any>> -> memref<1x128xf32, #tpu.memory_space<any>>
    %87 = tpu.memref_squeeze %86 : memref<1x128xf32, #tpu.memory_space<any>> -> memref<128xf32, #tpu.memory_space<any>>
    %c0_i32_46 = arith.constant 0 : i32
    %88 = tpu.memref_slice %arg9[%c1_i32_43, %c0_i32_46] : memref<8x128xf32, #tpu.memory_space<vmem>> -> memref<1x128xf32, #tpu.memory_space<vmem>>
    %89 = tpu.memref_squeeze %88 : memref<1x128xf32, #tpu.memory_space<vmem>> -> memref<128xf32, #tpu.memory_space<vmem>>
    %90 = tpu.memref_slice %arg10[%c1_i32_44] : memref<8x!tpu.dma_semaphore, #tpu.memory_space<semaphore_mem>> -> memref<1x!tpu.dma_semaphore, #tpu.memory_space<semaphore_mem>>
    %91 = tpu.memref_squeeze %90 : memref<1x!tpu.dma_semaphore, #tpu.memory_space<semaphore_mem>> -> memref<!tpu.dma_semaphore, #tpu.memory_space<semaphore_mem>>
    tpu.wait_dma2 semaphore(%91 : memref<!tpu.dma_semaphore, #tpu.memory_space<semaphore_mem>>) src(%87 : memref<128xf32, #tpu.memory_space<any>>) dst(%89 : memref<128xf32, #tpu.memory_space<vmem>>)
    %c2_i32_47 = arith.constant 2 : i32
    %c2_i32_48 = arith.constant 2 : i32
    %c0_i32_49 = arith.constant 0 : i32
    %92 = tpu.memref_slice %arg3[%23, %c0_i32_49] : memref<512x128xf32, #tpu.memory_space<any>> -> memref<1x128xf32, #tpu.memory_space<any>>
    %93 = tpu.memref_squeeze %92 : memref<1x128xf32, #tpu.memory_space<any>> -> memref<128xf32, #tpu.memory_space<any>>
    %c0_i32_50 = arith.constant 0 : i32
    %94 = tpu.memref_slice %arg9[%c2_i32_47, %c0_i32_50] : memref<8x128xf32, #tpu.memory_space<vmem>> -> memref<1x128xf32, #tpu.memory_space<vmem>>
    %95 = tpu.memref_squeeze %94 : memref<1x128xf32, #tpu.memory_space<vmem>> -> memref<128xf32, #tpu.memory_space<vmem>>
    %96 = tpu.memref_slice %arg10[%c2_i32_48] : memref<8x!tpu.dma_semaphore, #tpu.memory_space<semaphore_mem>> -> memref<1x!tpu.dma_semaphore, #tpu.memory_space<semaphore_mem>>
    %97 = tpu.memref_squeeze %96 : memref<1x!tpu.dma_semaphore, #tpu.memory_space<semaphore_mem>> -> memref<!tpu.dma_semaphore, #tpu.memory_space<semaphore_mem>>
    tpu.wait_dma2 semaphore(%97 : memref<!tpu.dma_semaphore, #tpu.memory_space<semaphore_mem>>) src(%93 : memref<128xf32, #tpu.memory_space<any>>) dst(%95 : memref<128xf32, #tpu.memory_space<vmem>>)
    %c3_i32_51 = arith.constant 3 : i32
    %c3_i32_52 = arith.constant 3 : i32
    %c0_i32_53 = arith.constant 0 : i32
    %98 = tpu.memref_slice %arg3[%33, %c0_i32_53] : memref<512x128xf32, #tpu.memory_space<any>> -> memref<1x128xf32, #tpu.memory_space<any>>
    %99 = tpu.memref_squeeze %98 : memref<1x128xf32, #tpu.memory_space<any>> -> memref<128xf32, #tpu.memory_space<any>>
    %c0_i32_54 = arith.constant 0 : i32
    %100 = tpu.memref_slice %arg9[%c3_i32_51, %c0_i32_54] : memref<8x128xf32, #tpu.memory_space<vmem>> -> memref<1x128xf32, #tpu.memory_space<vmem>>
    %101 = tpu.memref_squeeze %100 : memref<1x128xf32, #tpu.memory_space<vmem>> -> memref<128xf32, #tpu.memory_space<vmem>>
    %102 = tpu.memref_slice %arg10[%c3_i32_52] : memref<8x!tpu.dma_semaphore, #tpu.memory_space<semaphore_mem>> -> memref<1x!tpu.dma_semaphore, #tpu.memory_space<semaphore_mem>>
    %103 = tpu.memref_squeeze %102 : memref<1x!tpu.dma_semaphore, #tpu.memory_space<semaphore_mem>> -> memref<!tpu.dma_semaphore, #tpu.memory_space<semaphore_mem>>
    tpu.wait_dma2 semaphore(%103 : memref<!tpu.dma_semaphore, #tpu.memory_space<semaphore_mem>>) src(%99 : memref<128xf32, #tpu.memory_space<any>>) dst(%101 : memref<128xf32, #tpu.memory_space<vmem>>)
    %c4_i32_55 = arith.constant 4 : i32
    %c4_i32_56 = arith.constant 4 : i32
    %c0_i32_57 = arith.constant 0 : i32
    %104 = tpu.memref_slice %arg3[%43, %c0_i32_57] : memref<512x128xf32, #tpu.memory_space<any>> -> memref<1x128xf32, #tpu.memory_space<any>>
    %105 = tpu.memref_squeeze %104 : memref<1x128xf32, #tpu.memory_space<any>> -> memref<128xf32, #tpu.memory_space<any>>
    %c0_i32_58 = arith.constant 0 : i32
    %106 = tpu.memref_slice %arg9[%c4_i32_55, %c0_i32_58] : memref<8x128xf32, #tpu.memory_space<vmem>> -> memref<1x128xf32, #tpu.memory_space<vmem>>
    %107 = tpu.memref_squeeze %106 : memref<1x128xf32, #tpu.memory_space<vmem>> -> memref<128xf32, #tpu.memory_space<vmem>>
    %108 = tpu.memref_slice %arg10[%c4_i32_56] : memref<8x!tpu.dma_semaphore, #tpu.memory_space<semaphore_mem>> -> memref<1x!tpu.dma_semaphore, #tpu.memory_space<semaphore_mem>>
    %109 = tpu.memref_squeeze %108 : memref<1x!tpu.dma_semaphore, #tpu.memory_space<semaphore_mem>> -> memref<!tpu.dma_semaphore, #tpu.memory_space<semaphore_mem>>
    tpu.wait_dma2 semaphore(%109 : memref<!tpu.dma_semaphore, #tpu.memory_space<semaphore_mem>>) src(%105 : memref<128xf32, #tpu.memory_space<any>>) dst(%107 : memref<128xf32, #tpu.memory_space<vmem>>)
    %c5_i32_59 = arith.constant 5 : i32
    %c5_i32_60 = arith.constant 5 : i32
    %c0_i32_61 = arith.constant 0 : i32
    %110 = tpu.memref_slice %arg3[%53, %c0_i32_61] : memref<512x128xf32, #tpu.memory_space<any>> -> memref<1x128xf32, #tpu.memory_space<any>>
    %111 = tpu.memref_squeeze %110 : memref<1x128xf32, #tpu.memory_space<any>> -> memref<128xf32, #tpu.memory_space<any>>
    %c0_i32_62 = arith.constant 0 : i32
    %112 = tpu.memref_slice %arg9[%c5_i32_59, %c0_i32_62] : memref<8x128xf32, #tpu.memory_space<vmem>> -> memref<1x128xf32, #tpu.memory_space<vmem>>
    %113 = tpu.memref_squeeze %112 : memref<1x128xf32, #tpu.memory_space<vmem>> -> memref<128xf32, #tpu.memory_space<vmem>>
    %114 = tpu.memref_slice %arg10[%c5_i32_60] : memref<8x!tpu.dma_semaphore, #tpu.memory_space<semaphore_mem>> -> memref<1x!tpu.dma_semaphore, #tpu.memory_space<semaphore_mem>>
    %115 = tpu.memref_squeeze %114 : memref<1x!tpu.dma_semaphore, #tpu.memory_space<semaphore_mem>> -> memref<!tpu.dma_semaphore, #tpu.memory_space<semaphore_mem>>
    tpu.wait_dma2 semaphore(%115 : memref<!tpu.dma_semaphore, #tpu.memory_space<semaphore_mem>>) src(%111 : memref<128xf32, #tpu.memory_space<any>>) dst(%113 : memref<128xf32, #tpu.memory_space<vmem>>)
    %c6_i32_63 = arith.constant 6 : i32
    %c6_i32_64 = arith.constant 6 : i32
    %c0_i32_65 = arith.constant 0 : i32
    %116 = tpu.memref_slice %arg3[%63, %c0_i32_65] : memref<512x128xf32, #tpu.memory_space<any>> -> memref<1x128xf32, #tpu.memory_space<any>>
    %117 = tpu.memref_squeeze %116 : memref<1x128xf32, #tpu.memory_space<any>> -> memref<128xf32, #tpu.memory_space<any>>
    %c0_i32_66 = arith.constant 0 : i32
    %118 = tpu.memref_slice %arg9[%c6_i32_63, %c0_i32_66] : memref<8x128xf32, #tpu.memory_space<vmem>> -> memref<1x128xf32, #tpu.memory_space<vmem>>
    %119 = tpu.memref_squeeze %118 : memref<1x128xf32, #tpu.memory_space<vmem>> -> memref<128xf32, #tpu.memory_space<vmem>>
    %120 = tpu.memref_slice %arg10[%c6_i32_64] : memref<8x!tpu.dma_semaphore, #tpu.memory_space<semaphore_mem>> -> memref<1x!tpu.dma_semaphore, #tpu.memory_space<semaphore_mem>>
    %121 = tpu.memref_squeeze %120 : memref<1x!tpu.dma_semaphore, #tpu.memory_space<semaphore_mem>> -> memref<!tpu.dma_semaphore, #tpu.memory_space<semaphore_mem>>
    tpu.wait_dma2 semaphore(%121 : memref<!tpu.dma_semaphore, #tpu.memory_space<semaphore_mem>>) src(%117 : memref<128xf32, #tpu.memory_space<any>>) dst(%119 : memref<128xf32, #tpu.memory_space<vmem>>)
    %c7_i32_67 = arith.constant 7 : i32
    %c7_i32_68 = arith.constant 7 : i32
    %c0_i32_69 = arith.constant 0 : i32
    %122 = tpu.memref_slice %arg3[%73, %c0_i32_69] : memref<512x128xf32, #tpu.memory_space<any>> -> memref<1x128xf32, #tpu.memory_space<any>>
    %123 = tpu.memref_squeeze %122 : memref<1x128xf32, #tpu.memory_space<any>> -> memref<128xf32, #tpu.memory_space<any>>
    %c0_i32_70 = arith.constant 0 : i32
    %124 = tpu.memref_slice %arg9[%c7_i32_67, %c0_i32_70] : memref<8x128xf32, #tpu.memory_space<vmem>> -> memref<1x128xf32, #tpu.memory_space<vmem>>
    %125 = tpu.memref_squeeze %124 : memref<1x128xf32, #tpu.memory_space<vmem>> -> memref<128xf32, #tpu.memory_space<vmem>>
    %126 = tpu.memref_slice %arg10[%c7_i32_68] : memref<8x!tpu.dma_semaphore, #tpu.memory_space<semaphore_mem>> -> memref<1x!tpu.dma_semaphore, #tpu.memory_space<semaphore_mem>>
    %127 = tpu.memref_squeeze %126 : memref<1x!tpu.dma_semaphore, #tpu.memory_space<semaphore_mem>> -> memref<!tpu.dma_semaphore, #tpu.memory_space<semaphore_mem>>
    tpu.wait_dma2 semaphore(%127 : memref<!tpu.dma_semaphore, #tpu.memory_space<semaphore_mem>>) src(%123 : memref<128xf32, #tpu.memory_space<any>>) dst(%125 : memref<128xf32, #tpu.memory_space<vmem>>)
    %c0 = arith.constant 0 : index
    %c0_71 = arith.constant 0 : index
    %128 = vector.load %arg2[%c0, %c0_71] : memref<8x1xi32, #tpu.memory_space<vmem>>, vector<8x1xi32>
    %c0_72 = arith.constant 0 : index
    %c0_73 = arith.constant 0 : index
    %129 = vector.load %arg5[%c0_72, %c0_73] : memref<2x128xf32, #tpu.memory_space<vmem>>, vector<1x128xf32>
    %130 = vector.shape_cast %129 : vector<1x128xf32> to vector<1x128xf32>
    %131 = vector.broadcast %130 : vector<1x128xf32> to vector<8x128xf32>
    %c1_i32_74 = arith.constant 1 : i32
    %132 = vector.broadcast %c1_i32_74 : i32 to vector<8x1xi32>
    %133 = arith.cmpi eq, %128, %132 : vector<8x1xi32>
    %c1 = arith.constant 1 : index
    %c0_75 = arith.constant 0 : index
    %134 = vector.load %arg5[%c1, %c0_75] : memref<2x128xf32, #tpu.memory_space<vmem>>, vector<1x128xf32>
    %135 = vector.shape_cast %133 : vector<8x1xi1> to vector<8x1xi1>
    %136 = vector.broadcast %135 : vector<8x1xi1> to vector<8x128xi1>
    %137 = vector.shape_cast %134 : vector<1x128xf32> to vector<1x128xf32>
    %138 = vector.broadcast %137 : vector<1x128xf32> to vector<8x128xf32>
    %139 = arith.select %136, %138, %131 : vector<8x128xi1>, vector<8x128xf32>
    %c0_76 = arith.constant 0 : index
    %c0_77 = arith.constant 0 : index
    %140 = vector.load %arg9[%c0_76, %c0_77] : memref<8x128xf32, #tpu.memory_space<vmem>>, vector<8x128xf32>
    %141 = arith.addf %140, %139 : vector<8x128xf32>
    %c0_78 = arith.constant 0 : index
    %c0_79 = arith.constant 0 : index
    %142 = vector.load %arg4[%c0_78, %c0_79] : memref<8x128xf32, #tpu.memory_space<vmem>>, vector<8x128xf32>
    %143 = arith.addf %141, %142 : vector<8x128xf32>
    %cst = arith.constant dense<0.000000e+00> : vector<8xf32>
    %144 = vector.multi_reduction <add>, %143, %cst [1] : vector<8x128xf32> to vector<8xf32>
    %145 = vector.shape_cast %144 : vector<8xf32> to vector<8x1xf32>
    %cst_80 = arith.constant 1.280000e+02 : f32
    %146 = vector.broadcast %cst_80 : f32 to vector<8x1xf32>
    %147 = arith.divf %145, %146 : vector<8x1xf32>
    %148 = vector.broadcast %147 : vector<8x1xf32> to vector<8x128xf32>
    %149 = arith.subf %143, %148 : vector<8x128xf32>
    %150 = arith.mulf %149, %149 : vector<8x128xf32>
    %cst_81 = arith.constant dense<0.000000e+00> : vector<8xf32>
    %151 = vector.multi_reduction <add>, %150, %cst_81 [1] : vector<8x128xf32> to vector<8xf32>
    %152 = vector.shape_cast %151 : vector<8xf32> to vector<8x1xf32>
    %cst_82 = arith.constant 1.280000e+02 : f32
    %153 = vector.broadcast %cst_82 : f32 to vector<8x1xf32>
    %154 = arith.divf %152, %153 : vector<8x1xf32>
    %155 = vector.broadcast %147 : vector<8x1xf32> to vector<8x128xf32>
    %156 = arith.subf %143, %155 : vector<8x128xf32>
    %cst_83 = arith.constant 9.99999996E-13 : f32
    %157 = vector.broadcast %cst_83 : f32 to vector<8x1xf32>
    %158 = arith.addf %154, %157 : vector<8x1xf32>
    %159 = math.rsqrt %158 : vector<8x1xf32>
    %160 = vector.broadcast %159 : vector<8x1xf32> to vector<8x128xf32>
    %161 = arith.mulf %156, %160 : vector<8x128xf32>
    %c0_84 = arith.constant 0 : index
    %c0_85 = arith.constant 0 : index
    %162 = vector.load %arg6[%c0_84, %c0_85] : memref<1x128xf32, #tpu.memory_space<vmem>>, vector<1x128xf32>
    %163 = vector.broadcast %162 : vector<1x128xf32> to vector<8x128xf32>
    %164 = arith.mulf %161, %163 : vector<8x128xf32>
    %c0_86 = arith.constant 0 : index
    %c0_87 = arith.constant 0 : index
    %165 = vector.load %arg7[%c0_86, %c0_87] : memref<1x128xf32, #tpu.memory_space<vmem>>, vector<1x128xf32>
    %166 = vector.broadcast %165 : vector<1x128xf32> to vector<8x128xf32>
    %167 = arith.addf %164, %166 : vector<8x128xf32>
    %c0_88 = arith.constant 0 : index
    %c0_89 = arith.constant 0 : index
    %168 = vector.load %arg8[%c0_88, %c0_89] : memref<8x128xf32, #tpu.memory_space<vmem>>, vector<8x128xf32>
    tpu.vector_store %arg8[%c0_88, %c0_89], %167 {strides = array<i32>} : memref<8x128xf32, #tpu.memory_space<vmem>>, vector<8x128xf32>,
    return
  }
  func.func @transform_0(%arg0: i32, %arg1: memref<16xi32, #tpu.memory_space<smem>>) -> (i32, i32) {
    %c0_i32 = arith.constant 0 : i32
    %c0_i32_0 = arith.constant 0 : i32
    return %arg0, %c0_i32 : i32, i32
  }
  func.func @transform_2(%arg0: i32, %arg1: memref<16xi32, #tpu.memory_space<smem>>) -> (i32, i32) {
    %c0_i32 = arith.constant 0 : i32
    %c0_i32_0 = arith.constant 0 : i32
    %c0_i32_1 = arith.constant 0 : i32
    return %c0_i32, %c0_i32_0 : i32, i32
  }
  func.func @transform_3(%arg0: i32, %arg1: memref<16xi32, #tpu.memory_space<smem>>) -> (i32, i32) {
    %c0_i32 = arith.constant 0 : i32
    %c0_i32_0 = arith.constant 0 : i32
    %c0_i32_1 = arith.constant 0 : i32
    return %c0_i32, %c0_i32_0 : i32, i32
  }
  func.func @transform_4(%arg0: i32, %arg1: memref<16xi32, #tpu.memory_space<smem>>) -> (i32, i32) {
    %c0_i32 = arith.constant 0 : i32
    %c0_i32_0 = arith.constant 0 : i32
    %c0_i32_1 = arith.constant 0 : i32
    return %c0_i32, %c0_i32_0 : i32, i32
  }
  func.func @transform_5(%arg0: i32, %arg1: memref<16xi32, #tpu.memory_space<smem>>) -> (i32, i32) {
    %c0_i32 = arith.constant 0 : i32
    %c0_i32_0 = arith.constant 0 : i32
    %c0_i32_1 = arith.constant 0 : i32
    return %c0_i32, %c0_i32_0 : i32, i32
  }
  func.func @transform_6(%arg0: i32, %arg1: memref<16xi32, #tpu.memory_space<smem>>) -> (i32, i32) {
    %c0_i32 = arith.constant 0 : i32
    %c0_i32_0 = arith.constant 0 : i32
    return %arg0, %c0_i32 : i32, i32
  }
}

</mosaic_0001>

<bundles_post_ra>
// kernel: tpu_custom_call.1
= control target key start
LH: loop header
LB: loop body
LE: loop exit
PB: predicated region body
PF: predicated region fallthrough
CT: control target
= control target key end

     0   :  { %s1373_s0 = inlined_call_operand.vmem [shape: s32[16], index: 0, kind: input, shape index: {}]   ;;  %s1374_s1 = inlined_call_operand.vmem [shape: s32[16,1], index: 1, kind: input, shape index: {}]   ;;  %s1375_s2 = inlined_call_operand.hbm [shape: f32[512,128], index: 2, kind: input, shape index: {}]   ;;  %s1376_s3 = inlined_call_operand.hbm [shape: f32[64,128], index: 3, kind: input, shape index: {}]   ;;  %s1377_s4 = inlined_call_operand.vmem [shape: f32[2,128], index: 4, kind: input, shape index: {}]   ;;  %s1378_s5 = inlined_call_operand.vmem [shape: f32[1,128], index: 5, kind: input, shape index: {}]   ;;  %s1379_s6 = inlined_call_operand.vmem [shape: f32[1,128], index: 6, kind: input, shape index: {}]   ;;  %s1380_s7 = inlined_call_operand.hbm [shape: f32[16,128], index: 7, kind: output, shape index: {}]  }
   0x1   :  { %1391 = sst [smem:[#allocation45_spill]] %s1374_s1  ;;  %s12_s26 = sshll.u32 %s1373_s0, 4  ;;  %s13_s26 = int_to_ptr.vmem [resolvable:$true] %s12_s26 }
   0x2   :  { %1392 = sst [smem:[#allocation46_spill]] %s1376_s3  ;;  %s694_s27 = scalar_lea.vmem %s13_s26, 16 }
   0x3   :  { %p695_p0 = scmp.ne.s32.totalorder %s13_s26, %s694_s27  ;;  %p699_p1 = scmp.lt.s32.totalorder %s13_s26, %s13_s26 }
   0x4   :  { %p700_p2 = scmp.lt.s32.totalorder %s694_s27, %s694_s27 }
   0x6   :  { %p701_p3 = por %p700_p2, %p699_p1 }
   0x8   :  { %p702_p4 = pnand %p701_p3, %p695_p0 }
   0xa   :  { %705 = shalt.err (!%p702_p4)  }
   0xb   :  { %s1012_s28 = smov [#allocation5]  }
   0xc   :  { %15 = dma.vmem_to_smem %s13_s26, 16, %s1012_s28, [#allocation4] }
   0xd   :  { %970 = dma.done.wait [#allocation4], 16 }
   0xe   :  { %971 = vsyncadd [#allocation4], 4294967280 }
   0xf   :  { %17 = sfence }
  0x10   :  { %18 = vsyncpa [#allocation7], 0 }
  0x11   :  { %19 = vsyncpa [#allocation8], 0 }
  0x12   :  { %21 = vsyncpa [#allocation8 + $0x1], 0  ;;  %s1067_s29 = smov 0   ;;  %s1069_s30 = smov 0  }
  0x13   :  { %s1071_s0 = smov 0   ;;  %s1073_s8 = smov 0  }
  0x14 LB: > { %1393 = sst [smem:[#allocation39_spill]] %s998_s29  ;;  %s1088_s9 = sadd.s32 4294967295, %s1010_s8   ;;  %s1010_s8 = sphi %s1073_s8, %s1414_s8   ;;  %s1006_s0 = sphi %s1071_s0, %s1416_s0   ;;  %s1002_s30 = sphi %s1069_s30, %s1418_s30   ;;  %s998_s29 = sphi %s1067_s29, %s1417_s29  }
  0x15   : > { %1394 = sst [smem:[#allocation40_spill]] %s1006_s0  ;;  %s598_s10 = sadd.s32 4294967294, %s1010_s8  }
  0x16   : > { %1395 = sst [smem:[#allocation41_spill]] %s1010_s8  ;;  %s1092_s11 = sadd.s32 1, %s1010_s8  }
  0x17   : > { %1396 = sst [smem:[#allocation42_spill]] %s1092_s11  ;;  %s144_s12 = sadd.s32 1, %s1006_s0 }
  0x18   : > { %s141_s13 = ssub.s32 %s1010_s8, %s1092_s11  ;;  %p154_p5 = scmp.ne.s32.totalorder %s1006_s0, %s1002_s30 }
  0x19   : > { %p142_p6 = scmp.eq.s32.totalorder %s141_s13, 0  ;;  %p155_p7 = scmp.eq.s32.totalorder %s1088_s9, 1 }
  0x1a   : > { %p160_p8 = scmp.ne.s32.totalorder %s1002_s30, %s998_s29  ;;  %p161_p9 = scmp.eq.s32.totalorder %s598_s10, 1 }
  0x1b   : > { %s1103_s14 = scalar_select %p142_p6, %s1006_s0, %s144_s12  }
  0x1c   : > { %p1105_p10 = por %p155_p7, %p154_p5  ;;  %p1109_p11 = por %p161_p9, %p160_p8 }
  0x1d   : > { %1397 = sst [smem:[#allocation43_spill]] %s1103_s14  ;;  %p599_p12 = scmp.ge.s32.totalorder %s1010_s8, 1 }
  0x1e   : > { %s1398_s15 = scalar_select %p1105_p10, 1, 0 }
  0x1f   : > { %s1399_s16 = scalar_select %p1109_p11, 1, 0 }
  0x20   : > { %p168_p13 = scmp.lt.s32.totalorder %s1010_s8, 3  ;;  %p1381_p0 = scmp.eq.s32.totalorder %s1088_s9, 0 }
  0x21   : > { %1400 = sst [smem:[#allocation44_spill]] %s1399_s16  ;;  %s1013_s18 = smov [#allocation6]  }
  0x22   : > { %p1116_p1 = pnand %p599_p12, %p168_p13  ;;  %s181_s19 = sshll.u32 %s1013_s18, 4  ;;  %s182_s19 = int_to_ptr.vmem [resolvable:$true] %s181_s19 }
  0x23   : > { %s1403_s3 = sld [smem:[#allocation46_spill]] }
  0x24   : > { %s1401_s17 = scalar_select %p1116_p1, 1, 0 }
  0x25   : > { %p637_p2 = pneg %p1116_p1 }
  0x27   : > { %p1124_p3 = pnand %p1381_p0, %p637_p2 }
  0x29   : > { %s706_s23 = scalar_lea.hbm %s1403_s3, 128  ;;  %p708_p5 = pneg %p1124_p3 }
  0x2a   : > { %p707_p4 = scmp.ne.s32.totalorder %s1403_s3, %s706_s23  ;;  %s711_s28 = scalar_lea.hbm %s1403_s3, 1024 }
  0x2b   : > { %p712_p8 = scmp.lt.u32.totalorder %s711_s28, %s706_s23  ;;  %p713_p9 = scmp.lt.u32.totalorder %s706_s23, %s1403_s3 }
  0x2c   : > { %p709_p6 = pnand %p708_p5, %p707_p4 }
  0x2d   : > { %p714_p12 = por %p713_p9, %p712_p8 }
  0x2e   : > { %p710_p7 = pneg %p709_p6 }
  0x30   : > { %p715_p13 = pnand %p714_p12, %p710_p7 }
  0x32   : > { %718 = shalt.err (!%p715_p13)
}
  0x33   : > { %s719_s13 = scalar_lea.vmem %s182_s19, 128  ;;  %p727_p10 = scmp.lt.s32.totalorder %s182_s19, %s182_s19 }
  0x34   : > { %p720_p2 = scmp.ne.s32.totalorder %s182_s19, %s719_s13  ;;  %p728_p1 = scmp.lt.s32.totalorder %s719_s13, %s719_s13 }
  0x36   : > { %p722_p0 = pnand %p720_p2, %p708_p5  ;;  %p729_p4 = por %p728_p1, %p727_p10 }
  0x38   : > { %p723_p11 = pneg %p722_p0 }
  0x3a   : > { %p730_p6 = pnand %p729_p4, %p723_p11 }
  0x3c   : > { %733 = shalt.err (!%p730_p6)
}
  0x3d   : > { %640 = dma.hbm_to_vmem [thread:$0]  (!%p1124_p3), %s1403_s3, 128, %s182_s19, [#allocation7]  }
  0x3e   : > { %p1404_p8 = scmp.ne.s32.totalorder %s1401_s17, 0 }
  0x3f   : > { %p1405_p7 = scmp.eq.s32.totalorder (!%p1404_p8), %s1088_s9, 0 }
  0x40   : > { %210 = sbr.rel (%p1404_p8) target bundleno = 737 (0x2e1), region = 40 }
  0x47   : > { %973 = dma.done.wait (%p1405_p7), [#allocation7], 128   ;;  %p1406_p5 = pmov %p1405_p7 }
  0x48   : > { %s1384_s22 = sand.u32 1, %s1002_s30   ;;  %p237_p10 = scmp.lt.s32.totalorder %s1088_s9, 1 }
  0x49   : > { %975 = vsyncadd (%p1406_p5), [#allocation7], 4294967168  ;;  %s1157_s20 = sshll.u32 %s1384_s22, 3  ;;  %s1160_s19 = sshll.u32 %s1088_s9, 3 }
  0x4a   : > { %s242_s17 = sld [smem:[#allocation5 + %s1160_s19]]  ;;  %s256_s24 = sadd.s32 1, %s1160_s19 }
  0x4b   : > { %s238_s23 = scalar_select %p237_p10, %s1088_s9, 1 }
  0x4c   : > { %s1014_s26 = smov [#allocation2]   ;;  %s1407_s1 = sld [smem:[#allocation45_spill]] }
  0x4d   : > { %s605_s25 = sshll.u32 %s238_s23, 3  ;;  %s252_s27 = sshll.u32 %s1014_s26, 4  ;;  %s1170_s27 = int_to_ptr.vmem [resolvable:$true] %s252_s27 }
  0x4e   : > { %s1172_s13 = sld [smem:[#allocation5 + %s256_s24]]  ;;  %s1015_s21 = smov [#allocation2 + $0x1]  }
  0x4f   : > { %s269_s22 = sshll.u32 %s1015_s21, 4  ;;  %s1177_s22 = int_to_ptr.vmem [resolvable:$true] %s269_s22 }
  0x50   : > { %s607_s18 = sshll.u32 %s242_s17, 4 }
  0x51   : > { %s244_s0 = scalar_lea.hbm %s1375_s2, %s607_s18 }
  0x52   : > { %s1168_s12 = scalar_lea.vmem %s1407_s1, %s605_s25  ;;  %s734_s23 = scalar_lea.hbm %s244_s0, 16 }
  0x53   : > { %p735_p11 = scmp.ne.s32.totalorder %s244_s0, %s734_s23  ;;  %s1182_s25 = scalar_lea.hbm %s1375_s2, 8192 }
  0x54   : > { %p737_p0 = scmp.lt.u32.totalorder %s244_s0, %s1375_s2  ;;  %p738_p1 = scmp.lt.u32.totalorder %s1182_s25, %s734_s23 }
  0x55   : > { %p740_p9 = scmp.lt.u32.totalorder %s734_s23, %s244_s0 }
  0x56   : > { %p739_p3 = por %p738_p1, %p737_p0 }
  0x58   : > { %p741_p12 = por %p740_p9, %p739_p3 }
  0x5a   : > { %p742_p13 = pnand %p741_p12, %p735_p11 }
  0x5c   : > { %745 = shalt.err (!%p742_p13)  }
  0x5d   : > { %s746_s3 = scalar_lea.vmem %s1170_s27, 16  ;;  %s1191_s11 = scalar_lea.vmem %s1170_s27, 128 }
  0x5e   : > { %p747_p2 = scmp.ne.s32.totalorder %s1170_s27, %s746_s3  ;;  %p751_p4 = scmp.lt.s32.totalorder %s1170_s27, %s1170_s27 }
  0x5f   : > { %p752_p6 = scmp.lt.s32.totalorder %s1191_s11, %s746_s3 }
  0x61   : > { %p753_p8 = por %p752_p6, %p751_p4 }
  0x63   : > { %p754_p7 = pnand %p753_p8, %p747_p2 }
  0x65   : > { %757 = shalt.err (!%p754_p7)  }
  0x66   : > { %255 = dma.hbm_to_vmem [thread:$0]  %s244_s0, 16, %s1170_s27, [#allocation3] }
  0x67   : > { %s273_s14 = sadd.s32 2, %s1160_s19  ;;  %s1016_s24 = smov [#allocation2 + $0x2]  }
  0x68   : > { %s1198_s17 = sld [smem:[#allocation5 + %s273_s14]]  ;;  %s286_s18 = sshll.u32 %s1016_s24, 4  ;;  %s1201_s18 = int_to_ptr.vmem [resolvable:$true] %s286_s18 }
  0x69   : > { %s608_s21 = sshll.u32 %s1172_s13, 4  ;;  %s290_s10 = sadd.s32 3, %s1160_s19 }
  0x6a   : > { %s259_s28 = scalar_lea.hbm %s1375_s2, %s608_s21 }
  0x6b   : > { %s758_s3 = scalar_lea.hbm %s259_s28, 16  ;;  %p761_p10 = scmp.lt.u32.totalorder %s259_s28, %s1375_s2 }
  0x6c   : > { %p759_p5 = scmp.ne.s32.totalorder %s259_s28, %s758_s3  ;;  %p762_p11 = scmp.lt.u32.totalorder %s1182_s25, %s758_s3 }
  0x6d   : > { %p764_p1 = scmp.lt.u32.totalorder %s758_s3, %s259_s28 }
  0x6e   : > { %p763_p0 = por %p762_p11, %p761_p10 }
  0x70   : > { %p765_p3 = por %p764_p1, %p763_p0 }
  0x72   : > { %p766_p9 = pnand %p765_p3, %p759_p5 }
  0x74   : > { %769 = shalt.err (!%p766_p9)  }
  0x75   : > { %s770_s0 = scalar_lea.vmem %s1177_s22, 16  ;;  %p775_p13 = scmp.lt.s32.totalorder %s1177_s22, %s1170_s27 }
  0x76   : > { %p771_p12 = scmp.ne.s32.totalorder %s1177_s22, %s770_s0  ;;  %p776_p2 = scmp.lt.s32.totalorder %s1191_s11, %s770_s0 }
  0x78   : > { %p777_p4 = por %p776_p2, %p775_p13 }
  0x7a   : > { %p778_p6 = pnand %p777_p4, %p771_p12 }
  0x7c   : > { %781 = shalt.err (!%p778_p6)  }
  0x7d   : > { %272 = dma.hbm_to_vmem [thread:$0]  %s259_s28, 16, %s1177_s22, [#allocation3 + $0x1] }
  0x7e   : > { %s1217_s1 = sld [smem:[#allocation5 + %s290_s10]]  ;;  %s1017_s16 = smov [#allocation2 + $0x3]  }
  0x7f   : > { %s303_s13 = sshll.u32 %s1017_s16, 4  ;;  %s307_s14 = sadd.s32 4, %s1160_s19  ;;  %s1221_s13 = int_to_ptr.vmem [resolvable:$true] %s303_s13 }
  0x80   : > { %s609_s24 = sshll.u32 %s1198_s17, 4  ;;  %s1226_s3 = sld [smem:[#allocation5 + %s307_s14]] }
  0x81   : > { %s276_s26 = scalar_lea.hbm %s1375_s2, %s609_s24 }
  0x82   : > { %s782_s0 = scalar_lea.hbm %s276_s26, 16  ;;  %p785_p7 = scmp.lt.u32.totalorder %s276_s26, %s1375_s2 }
  0x83   : > { %p783_p8 = scmp.ne.s32.totalorder %s276_s26, %s782_s0  ;;  %p786_p5 = scmp.lt.u32.totalorder %s1182_s25, %s782_s0 }
  0x84   : > { %p788_p11 = scmp.lt.u32.totalorder %s782_s0, %s276_s26 }
  0x85   : > { %p787_p10 = por %p786_p5, %p785_p7 }
  0x87   : > { %p789_p0 = por %p788_p11, %p787_p10 }
  0x89   : > { %p790_p1 = pnand %p789_p0, %p783_p8 }
  0x8b   : > { %793 = shalt.err (!%p790_p1)  }
  0x8c   : > { %s794_s22 = scalar_lea.vmem %s1201_s18, 16  ;;  %p799_p9 = scmp.lt.s32.totalorder %s1201_s18, %s1170_s27 }
  0x8d   : > { %p795_p3 = scmp.ne.s32.totalorder %s1201_s18, %s794_s22  ;;  %p800_p12 = scmp.lt.s32.totalorder %s1191_s11, %s794_s22 }
  0x8f   : > { %p801_p13 = por %p800_p12, %p799_p9 }
  0x91   : > { %p802_p2 = pnand %p801_p13, %p795_p3 }
  0x93   : > { %805 = shalt.err (!%p802_p2)  }
  0x94   : > { %289 = dma.hbm_to_vmem [thread:$0]  %s276_s26, 16, %s1201_s18, [#allocation3 + $0x2] }
  0x95   : > { %s324_s29 = sadd.s32 5, %s1160_s19  ;;  %s610_s8 = sshll.u32 %s1217_s1, 4 }
  0x96   : > { %s1018_s17 = smov [#allocation2 + $0x4]   ;;  %s293_s14 = scalar_lea.hbm %s1375_s2, %s610_s8 }
  0x97   : > { %s320_s28 = sshll.u32 %s1018_s17, 4  ;;  %s806_s24 = scalar_lea.hbm %s293_s14, 16  ;;  %s1243_s28 = int_to_ptr.vmem [resolvable:$true] %s320_s28 }
  0x98   : > { %p807_p4 = scmp.ne.s32.totalorder %s293_s14, %s806_s24  ;;  %p809_p6 = scmp.lt.u32.totalorder %s293_s14, %s1375_s2 }
  0x99   : > { %p810_p8 = scmp.lt.u32.totalorder %s1182_s25, %s806_s24  ;;  %p812_p5 = scmp.lt.u32.totalorder %s806_s24, %s293_s14 }
  0x9b   : > { %p811_p7 = por %p810_p8, %p809_p6 }
  0x9d   : > { %p813_p10 = por %p812_p5, %p811_p7 }
  0x9f   : > { %p814_p11 = pnand %p813_p10, %p807_p4 }
  0xa1   : > { %817 = shalt.err (!%p814_p11)  }
  0xa2   : > { %s818_s18 = scalar_lea.vmem %s1221_s13, 16  ;;  %p823_p1 = scmp.lt.s32.totalorder %s1221_s13, %s1170_s27 }
  0xa3   : > { %p819_p0 = scmp.ne.s32.totalorder %s1221_s13, %s818_s18  ;;  %p824_p3 = scmp.lt.s32.totalorder %s1191_s11, %s818_s18 }
  0xa5   : > { %p825_p9 = por %p824_p3, %p823_p1 }
  0xa7   : > { %p826_p12 = pnand %p825_p9, %p819_p0 }
  0xa9   : > { %829 = shalt.err (!%p826_p12)  }
  0xaa   : > { %306 = dma.hbm_to_vmem [thread:$0]  %s293_s14, 16, %s1221_s13, [#allocation3 + $0x3] }
  0xab   : > { %s611_s1 = sshll.u32 %s1226_s3, 4  ;;  %s1256_s26 = sld [smem:[#allocation5 + %s324_s29]] }
  0xac   : > { %s310_s8 = scalar_lea.hbm %s1375_s2, %s611_s1 }
  0xad   : > { %s830_s17 = scalar_lea.hbm %s310_s8, 16  ;;  %p833_p2 = scmp.lt.u32.totalorder %s310_s8, %s1375_s2 }
  0xae   : > { %p831_p13 = scmp.ne.s32.totalorder %s310_s8, %s830_s17  ;;  %p834_p4 = scmp.lt.u32.totalorder %s1182_s25, %s830_s17 }
  0xaf   : > { %p836_p8 = scmp.lt.u32.totalorder %s830_s17, %s310_s8 }
  0xb0   : > { %p835_p6 = por %p834_p4, %p833_p2 }
  0xb2   : > { %p837_p7 = por %p836_p8, %p835_p6 }
  0xb4   : > { %p838_p5 = pnand %p837_p7, %p831_p13 }
  0xb6   : > { %841 = shalt.err (!%p838_p5)  }
  0xb7   : > { %s842_s13 = scalar_lea.vmem %s1243_s28, 16  ;;  %p847_p11 = scmp.lt.s32.totalorder %s1243_s28, %s1170_s27 }
  0xb8   : > { %p843_p10 = scmp.ne.s32.totalorder %s1243_s28, %s842_s13  ;;  %p848_p0 = scmp.lt.s32.totalorder %s1191_s11, %s842_s13 }
  0xba   : > { %p849_p1 = por %p848_p0, %p847_p11 }
  0xbc   : > { %p850_p3 = pnand %p849_p1, %p843_p10 }
  0xbe   : > { %853 = shalt.err (!%p850_p3)  }
  0xbf   : > { %323 = dma.hbm_to_vmem [thread:$0]  %s310_s8, 16, %s1243_s28, [#allocation3 + $0x4] }
  0xc0   : > { %s1019_s3 = smov [#allocation2 + $0x5]   ;;  %s341_s14 = sadd.s32 6, %s1160_s19 }
  0xc1   : > { %s337_s29 = sshll.u32 %s1019_s3, 4  ;;  %s342_s24 = sld [smem:[#allocation5 + %s341_s14]]  ;;  %s338_s29 = int_to_ptr.vmem [resolvable:$true] %s337_s29 }
  0xc2   : > { %s358_s21 = sadd.s32 7, %s1160_s19  ;;  %s612_s23 = sshll.u32 %s1256_s26, 4 }
  0xc3   : > { %s1020_s18 = smov [#allocation2 + $0x6]   ;;  %s327_s17 = scalar_lea.hbm %s1375_s2, %s612_s23 }
  0xc4   : > { %s354_s1 = sshll.u32 %s1020_s18, 4  ;;  %s854_s10 = scalar_lea.hbm %s327_s17, 16  ;;  %s1277_s1 = int_to_ptr.vmem [resolvable:$true] %s354_s1 }
  0xc5   : > { %p855_p9 = scmp.ne.s32.totalorder %s327_s17, %s854_s10  ;;  %p857_p12 = scmp.lt.u32.totalorder %s327_s17, %s1375_s2 }
  0xc6   : > { %p858_p13 = scmp.lt.u32.totalorder %s1182_s25, %s854_s10  ;;  %p860_p4 = scmp.lt.u32.totalorder %s854_s10, %s327_s17 }
  0xc8   : > { %p859_p2 = por %p858_p13, %p857_p12 }
  0xca   : > { %p861_p6 = por %p860_p4, %p859_p2 }
  0xcc   : > { %p862_p8 = pnand %p861_p6, %p855_p9 }
  0xce   : > { %865 = shalt.err (!%p862_p8)  }
  0xcf   : > { %s866_s19 = scalar_lea.vmem %s338_s29, 16  ;;  %p871_p5 = scmp.lt.s32.totalorder %s338_s29, %s1170_s27 }
  0xd0   : > { %p867_p7 = scmp.ne.s32.totalorder %s338_s29, %s866_s19  ;;  %p872_p10 = scmp.lt.s32.totalorder %s1191_s11, %s866_s19 }
  0xd2   : > { %p873_p11 = por %p872_p10, %p871_p5 }
  0xd4   : > { %p874_p0 = pnand %p873_p11, %p867_p7 }
  0xd6   : > { %877 = shalt.err (!%p874_p0)  }
  0xd7   : > { %340 = dma.hbm_to_vmem [thread:$0]  %s327_s17, 16, %s338_s29, [#allocation3 + $0x5] }
  0xd8   : > { %s359_s28 = sld [smem:[#allocation5 + %s358_s21]]  ;;  %s613_s26 = sshll.u32 %s342_s24, 4 }
  0xd9   : > { %s344_s14 = scalar_lea.hbm %s1375_s2, %s613_s26  ;;  %s1021_s23 = smov [#allocation2 + $0x7]  }
  0xda   : > { %s371_s18 = sshll.u32 %s1021_s23, 4  ;;  %s878_s0 = scalar_lea.hbm %s344_s14, 16  ;;  %s372_s18 = int_to_ptr.vmem [resolvable:$true] %s371_s18 }
  0xdb   : > { %p879_p1 = scmp.ne.s32.totalorder %s344_s14, %s878_s0  ;;  %p881_p3 = scmp.lt.u32.totalorder %s344_s14, %s1375_s2 }
  0xdc   : > { %p882_p9 = scmp.lt.u32.totalorder %s1182_s25, %s878_s0  ;;  %p884_p13 = scmp.lt.u32.totalorder %s878_s0, %s344_s14 }
  0xde   : > { %p883_p12 = por %p882_p9, %p881_p3 }
  0xe0   : > { %p885_p2 = por %p884_p13, %p883_p12 }
  0xe2   : > { %p886_p4 = pnand %p885_p2, %p879_p1 }
  0xe4   : > { %889 = shalt.err (!%p886_p4)  }
  0xe5   : > { %s890_s29 = scalar_lea.vmem %s1277_s1, 16  ;;  %p895_p8 = scmp.lt.s32.totalorder %s1277_s1, %s1170_s27 }
  0xe6   : > { %p891_p6 = scmp.ne.s32.totalorder %s1277_s1, %s890_s29  ;;  %p896_p7 = scmp.lt.s32.totalorder %s1191_s11, %s890_s29 }
  0xe8   : > { %p897_p5 = por %p896_p7, %p895_p8 }
  0xea   : > { %p898_p10 = pnand %p897_p5, %p891_p6 }
  0xec   : > { %901 = shalt.err (!%p898_p10)  }
  0xed   : > { %357 = dma.hbm_to_vmem [thread:$0]  %s344_s14, 16, %s1277_s1, [#allocation3 + $0x6] }
  0xee   : > { %s614_s24 = sshll.u32 %s359_s28, 4 }
  0xef   : > { %s361_s16 = scalar_lea.hbm %s1375_s2, %s614_s24 }
  0xf0   : > { %s902_s13 = scalar_lea.hbm %s361_s16, 16  ;;  %p905_p0 = scmp.lt.u32.totalorder %s361_s16, %s1375_s2 }
  0xf1   : > { %p903_p11 = scmp.ne.s32.totalorder %s361_s16, %s902_s13  ;;  %p906_p1 = scmp.lt.u32.totalorder %s1182_s25, %s902_s13 }
  0xf2   : > { %p908_p9 = scmp.lt.u32.totalorder %s902_s13, %s361_s16 }
  0xf3   : > { %p907_p3 = por %p906_p1, %p905_p0 }
  0xf5   : > { %p909_p12 = por %p908_p9, %p907_p3 }
  0xf7   : > { %p910_p13 = pnand %p909_p12, %p903_p11 }
  0xf9   : > { %913 = shalt.err (!%p910_p13)  }
  0xfa   : > { %s914_s8 = scalar_lea.vmem %s372_s18, 16  ;;  %p919_p4 = scmp.lt.s32.totalorder %s372_s18, %s1170_s27 }
  0xfb   : > { %p915_p2 = scmp.ne.s32.totalorder %s372_s18, %s914_s8  ;;  %p920_p6 = scmp.lt.s32.totalorder %s1191_s11, %s914_s8 }
  0xfd   : > { %p921_p8 = por %p920_p6, %p919_p4 }
  0xff   : > { %p922_p7 = pnand %p921_p8, %p915_p2 }
 0x101   : > { %925 = shalt.err (!%p922_p7)  }
 0x102   : > { %374 = dma.hbm_to_vmem [thread:$0]  %s361_s16, 16, %s372_s18, [#allocation3 + $0x7] }
 0x103   : > { %s236_s1 = scalar_lea.vmem [#allocation9], %s1157_s20 }
 0x104   : > { %976 = dma.done.wait [#allocation3], 16 }
 0x105   : > { %977 = vsyncadd [#allocation3], 4294967280 }
 0x106   : > { %978 = dma.done.wait [#allocation3 + $0x1], 16 }
 0x107   : > { %979 = vsyncadd [#allocation3 + $0x1], 4294967280 }
 0x108   : > { %980 = dma.done.wait [#allocation3 + $0x2], 16 }
 0x109   : > { %981 = vsyncadd [#allocation3 + $0x2], 4294967280 }
 0x10a   : > { %982 = dma.done.wait [#allocation3 + $0x3], 16 }
 0x10b   : > { %983 = vsyncadd [#allocation3 + $0x3], 4294967280 }
 0x10c   : > { %984 = dma.done.wait [#allocation3 + $0x4], 16 }
 0x10d   : > { %985 = vsyncadd [#allocation3 + $0x4], 4294967280 }
 0x10e   : > { %986 = dma.done.wait [#allocation3 + $0x5], 16 }
 0x10f   : > { %987 = vsyncadd [#allocation3 + $0x5], 4294967280 }
 0x110   : > { %988 = dma.done.wait [#allocation3 + $0x6], 16 }
 0x111   : > { %989 = vsyncadd [#allocation3 + $0x6], 4294967280 }
 0x112   : > { %990 = dma.done.wait [#allocation3 + $0x7], 16 }
 0x113   : > { %991 = vsyncadd [#allocation3 + $0x7], 4294967280  ;;  %v1022_v0 = vmov 0   ;;  %v391_v1 = vld [vmem:[%s1168_s12] sm:$0xff]  ;;  %v411_v8 = vld [vmem:[#allocation6] sm:$0xff]  ;;  %s620_s18 = sshll.u32 %s1088_s9, 7 }
 0x114   : > { %691 = vset.pattern.permute.xlu0 %v1022_v0  ;;  %vm397_vm0 = vcmp.eq.s32.totalorder %v391_v1, 1  ;;  %v615_v3 = vld [vmem:[%s1377_s4] ss:$0 sm:$0xff]  ;;  %v616_v4 = vld [vmem:[%s1377_s4 + $0x1] ss:$0 sm:$0xff]  ;;  %s456_s0 = sshll.u32 %s236_s1, 4  ;;  %s1327_s29 = scalar_lea.hbm %s1380_s7, %s620_s18  ;;  %s1329_s0 = int_to_ptr.vmem [resolvable:$true] %s456_s0 }
 0x115   : > { %v399_v2 = vsel %vm397_vm0, 1, %v1022_v0  ;;  %v409_v6 = vld [vmem:[#allocation2] sm:$0xff]  ;;  %s1408_s24 = sand.u32 1, %s1002_s30   ;;  %s926_s17 = scalar_lea.vmem %s1329_s0, 128 }
 0x116   : > { %401 = vperm.xlu0 %691, %v399_v2   ;;  %v617_v19 = vld [vmem:[%s1378_s5] ss:$0 sm:$0xff]  ;;  %s443_s21 = scalar_lea.sflag [#allocation8], %s1408_s24  ;;  %p927_p5 = scmp.ne.s32.totalorder %s1329_s0, %s926_s17 }
 0x117   : > { %v618_v21 = vld [vmem:[%s1379_s6] ss:$0 sm:$0xff]  ;;  %p1409_p10 = scmp.ne.s32.totalorder %s1398_s15, 0  ;;  %s1023_s9 = smov [#allocation9]  }
 0x118   : > { %s930_s16 = sshll.u32 %s1023_s9, 4  ;;  %s931_s16 = int_to_ptr.vmem [resolvable:$false] %s930_s16 }
 0x119   : > { %p928_p11 = pnand %p927_p5, %p1409_p10  ;;  %s932_s13 = scalar_lea.vmem %s931_s16, 256 }
 0x11a   : > { %p933_p1 = scmp.lt.s32.totalorder %s1329_s0, %s931_s16  ;;  %p934_p3 = scmp.lt.s32.totalorder %s932_s13, %s926_s17 }
 0x11b   : > { %p929_p0 = pneg %p928_p11 }
 0x11c   : > { %p935_p9 = por %p934_p3, %p933_p1 }
 0x11e   : > { %p936_p12 = pnand %p935_p9, %p929_p0 }
 0x195   : > { %v402_v5 = vpop.permute.xlu0 %401 }
 0x196   : > { %vm403_vm1 = vcmp.eq.s32.totalorder %v402_v5, 1 }
 0x197   : > { %v408_v7 = vsel %vm403_vm1, %v616_v4, %v615_v3 }
 0x198   : > { %v410_v9 = vadd.f32 %v409_v6, %v408_v7 }
 0x19a   : > { %v412_v10 = vadd.f32 %v411_v8, %v410_v9 }
 0x19c   : > { %413 = vadd.xlane.f32.xlu0 %v412_v10 }
 0x229   : > { %v414_v11 = vpop.xlane.xlu0 %413 }
 0x22a   : > { %v416_v12 = vmul.f32 0.0078125, %v414_v11 }
 0x22c   : > { %v417_v13 = vsub.f32 %v412_v10, %v416_v12 }
 0x22e   : > { %v418_v14 = vmul.f32 %v417_v13, %v417_v13 }
 0x230   : > { %419 = vadd.xlane.f32.xlu1 %v418_v14 }
 0x2bd   : > { %v420_v15 = vpop.xlane.xlu1 %419 }
 0x2be   : > { %v421_v16 = vmul.f32 0.0078125, %v420_v15 }
 0x2c0   : > { %v422_v17 = vadd.f32 1e-12, %v421_v16 }
 0x2c2   : > { %692 = vrsqrt.f32 %v422_v17 }
 0x2cc   : > { %v693_v18 = vpop.eup %692 }
 0x2cd   : > { %v424_v20 = vmul.f32 %v693_v18, %v417_v13 }
 0x2cf   : > { %v432_v22 = vmul.f32 %v617_v19, %v424_v20 }
 0x2d1   : > { %v440_v23 = vadd.f32 %v618_v21, %v432_v22 }
 0x2d3   : > { %441 = vst [vmem:[%s236_s1] sm:$0xff] %v440_v23 }
 0x2d4   : > { %939 = shalt.err (!%p936_p12)
}
 0x2d5   : > { %s940_s20 = scalar_lea.hbm %s1327_s29, 128  ;;  %s944_s8 = scalar_lea.hbm %s1380_s7, 256 }
 0x2d6   : > { %p941_p13 = scmp.ne.s32.totalorder %s1327_s29, %s940_s20  ;;  %p945_p6 = scmp.lt.u32.totalorder %s1327_s29, %s1380_s7 }
 0x2d7   : > { %p946_p8 = scmp.lt.u32.totalorder %s944_s8, %s940_s20  ;;  %p948_p5 = scmp.lt.u32.totalorder %s940_s20, %s1327_s29 }
 0x2d8   : > { %p942_p2 = pnand %p941_p13, %p1409_p10 }
 0x2d9   : > { %p947_p7 = por %p946_p8, %p945_p6 }
 0x2da   : > { %p943_p4 = pneg %p942_p2 }
 0x2db   : > { %p949_p11 = por %p948_p5, %p947_p7 }
 0x2dd   : > { %p950_p0 = pnand %p949_p11, %p943_p4 }
 0x2df   : > { %953 = shalt.err (!%p950_p0)
}
 0x2e0   : > { %635 = dma.vmem_to_hbm [thread:$0]  (%p1409_p10), %s1329_s0, 128, %s1327_s29, %s443_s21  }
 0x2e1 PF: > { %s1410_s25 = sld [smem:[#allocation41_spill]]  ;;  %s1411_s11 = sld [smem:[#allocation39_spill]] }
 0x2e2   : > { %s1412_s28 = sld [smem:[#allocation44_spill]] }
 0x2e7   : > { %p647_p1 = scmp.ge.s32.totalorder %s1410_s25, 2  ;;  %s468_s12 = sand.u32 1, %s1411_s11  }
 0x2e8   : > { %p1413_p3 = scmp.ne.s32.totalorder %s1412_s28, 0  ;;  %s469_s3 = scalar_lea.sflag [#allocation8], %s468_s12 }
 0x2ea   : > { %p642_p9 = pnand %p647_p1, %p1413_p3 }
 0x2ec   : > { %993 = dma.done.wait (!%p642_p9), %s469_s3, 128  }
 0x2ed   : > { %995 = vsyncadd (!%p642_p9), %s469_s3, 4294967168  ;;  %s1414_s8 = sld [smem:[#allocation42_spill]]  ;;  %s1415_s14 = sld [smem:[#allocation40_spill]] }
 0x2ee   : > { %s1416_s0 = sld [smem:[#allocation43_spill]]  ;;  %s1417_s29 = smov %s1002_s30 }
 0x2f3   : > { %p24_p12 = scmp.ge.s32.totalorder %s1414_s8, 4   ;;  %s1418_s30 = smov %s1415_s14 }
 0x2f5   :  { %26 = sbr.rel (!%p24_p12) target bundleno = 20 (0x14), region = 141 }
 0x2fc   :  { %474 = vsyncpa [#allocation7], 1 }
 0x2fd   :  { %476 = vsyncpa [#allocation7 + $0x1], 1 }
 0x2fe   :  { %477 = vsyncpa [#allocation8], 1 }
 0x2ff   :  { %479 = vsyncpa [#allocation8 + $0x1], 1 }
 0x300   :  { %480 = vsyncmov [#allocation3] }
 0x303   :  { %s481_s15 = vpop.sfrf %480 }
 0x304   :  { %p623_p10 = scmp.ne.s32.totalorder %s481_s15, 0 }
 0x306   :  { %485 = shalt.err (%p623_p10)  }
 0x307   :  { %487 = vsyncmov [#allocation3 + $0x1] }
 0x30a   :  { %s488_s23 = vpop.sfrf %487 }
 0x30b   :  { %p624_p13 = scmp.ne.s32.totalorder %s488_s23, 0 }
 0x30d   :  { %492 = shalt.err (%p624_p13)  }
 0x30e   :  { %494 = vsyncmov [#allocation3 + $0x2] }
 0x311   :  { %s495_s18 = vpop.sfrf %494 }
 0x312   :  { %p625_p2 = scmp.ne.s32.totalorder %s495_s18, 0 }
 0x314   :  { %499 = shalt.err (%p625_p2)  }
 0x315   :  { %501 = vsyncmov [#allocation3 + $0x3] }
 0x318   :  { %s502_s22 = vpop.sfrf %501 }
 0x319   :  { %p626_p4 = scmp.ne.s32.totalorder %s502_s22, 0 }
 0x31b   :  { %506 = shalt.err (%p626_p4)  }
 0x31c   :  { %508 = vsyncmov [#allocation3 + $0x4] }
 0x31f   :  { %s509_s2 = vpop.sfrf %508 }
 0x320   :  { %p627_p6 = scmp.ne.s32.totalorder %s509_s2, 0 }
 0x322   :  { %513 = shalt.err (%p627_p6)  }
 0x323   :  { %515 = vsyncmov [#allocation3 + $0x5] }
 0x326   :  { %s516_s4 = vpop.sfrf %515 }
 0x327   :  { %p628_p8 = scmp.ne.s32.totalorder %s516_s4, 0 }
 0x329   :  { %520 = shalt.err (%p628_p8)  }
 0x32a   :  { %522 = vsyncmov [#allocation3 + $0x6] }
 0x32d   :  { %s523_s5 = vpop.sfrf %522 }
 0x32e   :  { %p629_p7 = scmp.ne.s32.totalorder %s523_s5, 0 }
 0x330   :  { %527 = shalt.err (%p629_p7)  }
 0x331   :  { %529 = vsyncmov [#allocation3 + $0x7] }
 0x334   :  { %s530_s6 = vpop.sfrf %529 }
 0x335   :  { %p630_p5 = scmp.ne.s32.totalorder %s530_s6, 0 }
 0x337   :  { %534 = shalt.err (%p630_p5)  }

</bundles_post_ra>
